<compile_context>
chip_gen: v6e
topology: v6e:2x2x1
jax: 0.10.0
libtpu: 0.0.40
codegen_flags: <defaults>
</compile_context>

<pallas_src>
import functools

import jax
import jax.numpy as jnp
from jax.experimental import pallas as pl
from jax.experimental.pallas import tpu as pltpu

EPS = 1e-5
# Gate for the fused single-pass path (f32 working-set bytes of the activation).
# Conservative enough for v7x's 64 MiB physical VMEM with a 48 MiB scoped limit.
_FUSED_BYTES_F32 = 8 * 1024 * 1024
_VMEM_LIMIT = 48 << 20


# ----------------------------- Pallas kernels ------------------------------ #
def _bn_fused_kernel(gamma_ref, beta_ref, x_ref, o_ref, *, inv_m, eps):
    """Whole activation resident in VMEM: stats + normalize in one pass."""
    x = x_ref[...].astype(jnp.float32)                       # (N, C, HW)
    # Per-channel mean over (N, HW): lane reduce then leading-axis reduce.
    mean = jnp.sum(jnp.sum(x, axis=2, keepdims=True),
                   axis=0, keepdims=True) * inv_m            # (1, C, 1)
    xc = x - mean
    # Exact centered variance (robust vs. E[x^2]-E[x]^2 cancellation).
    var = jnp.sum(jnp.sum(xc * xc, axis=2, keepdims=True),
                  axis=0, keepdims=True) * inv_m             # (1, C, 1)
    inv_std = jax.lax.rsqrt(var + eps)                       # EUP slot
    scale = gamma_ref[...][None] * inv_std                   # (1, C, 1)
    shift = beta_ref[...][None]                              # (1, C, 1)
    o_ref[...] = (xc * scale + shift).astype(o_ref.dtype)


def _bn_stats_kernel(x_ref, sum_ref, ssq_ref, *, hw_total, hw_tile,
                     tiles_per_group, num_t, need_mask):
    """Accumulate per-(batch, group, channel) sum / sum-of-squares over tiles."""
    t = pl.program_id(2)
    t_global = pl.program_id(1) * tiles_per_group + t

    @pl.when(t == 0)
    def _init():
        sum_ref[...] = jnp.zeros_like(sum_ref)
        ssq_ref[...] = jnp.zeros_like(ssq_ref)

    x = x_ref[0].astype(jnp.float32)                         # (C, hw_tile)

    def _accum(xv):
        sum_ref[0] += jnp.sum(xv, axis=1, keepdims=True)     # (C, 1)
        ssq_ref[0] += jnp.sum(xv * xv, axis=1, keepdims=True)

    if need_mask:
        # Mask out-of-bounds lanes only on the single partial last tile.
        @pl.when(t_global == num_t - 1)
        def _last_tile():
            col = t_global * hw_tile + jax.lax.broadcasted_iota(
                jnp.int32, x.shape, 1)
            _accum(jnp.where(col < hw_total, x, 0.0))

        @pl.when(t_global != num_t - 1)
        def _full_tile():
            _accum(x)
    else:
        _accum(x)


def _bn_apply_kernel(sums_ref, ssqs_ref, gamma_ref, beta_ref, x_ref, o_ref,
                     *, inv_m, eps):
    """Streaming y = x * scale + shift; scale/shift folded in-kernel."""
    # Tiny per-step work (P*C adds + C rsqrt) sits in VPU/EUP slack of this
    # memory-bound kernel; the small partials blocks are only DMA'd once
    # (constant block index across the grid).
    s1 = jnp.sum(sums_ref[...], axis=0)                      # (C, 1)
    s2 = jnp.sum(ssqs_ref[...], axis=0)                      # (C, 1)
    mean = s1 * inv_m
    # TODO(synk): streaming path uses E[x^2]-E[x]^2 in f32 (guarded with max);
    # the fused path computes exact centered variance instead.
    var = jnp.maximum(s2 * inv_m - mean * mean, 0.0)
    inv_std = jax.lax.rsqrt(var + eps)                       # EUP slot
    scale = gamma_ref[...] * inv_std                         # (C, 1)
    shift = beta_ref[...] - mean * scale                     # (C, 1)
    x = x_ref[0].astype(jnp.float32)                         # (C, hw_tile)
    o_ref[0] = (x * scale + shift).astype(o_ref.dtype)


# ------------------------------ Host wrapper ------------------------------- #
def _choose_hw_tile(hw, c, itemsize):
    # ~4 MiB per block copy (review: 2 MiB becomes grid-overhead-limited on
    # v7x's 3.2 TB/s HBM).  Phase 2 double-buffers input AND output, so live
    # VMEM ~16 MiB + temps, comfortably under the 48 MiB scoped limit we set.
    budget = 4 * 1024 * 1024
    max_elems = budget // max(1, c * itemsize)
    if hw <= max_elems:
        return hw
    return max(128, (max_elems // 128) * 128)


@functools.partial(jax.jit,
                   static_argnames=("eps", "fused_vmem_bytes", "hw_tile"))
def batchnorm2d_pallas(x_nchw, gamma, beta, eps=EPS,
                       fused_vmem_bytes=_FUSED_BYTES_F32, hw_tile=None):
    """Training-mode BatchNorm2d on an NCHW tensor using batch statistics."""
    n, c, h, w = x_nchw.shape
    hw = h * w
    itemsize = jnp.dtype(x_nchw.dtype).itemsize

    x3 = x_nchw.reshape(n, c, hw)            # free view of contiguous NCHW
    g32 = gamma.astype(jnp.float32).reshape(c, 1)
    b32 = beta.astype(jnp.float32).reshape(c, 1)
    m = float(n * hw)

    # ---------------- fused single-pass path (x fits in VMEM) -------------- #
    f32_bytes = n * c * hw * 4
    if f32_bytes <= fused_vmem_bytes:
        out3 = pl.pallas_call(
            functools.partial(_bn_fused_kernel, inv_m=1.0 / m, eps=float(eps)),
            out_shape=jax.ShapeDtypeStruct((n, c, hw), x_nchw.dtype),
            in_specs=[pl.BlockSpec(memory_space=pltpu.MemorySpace.VMEM),
                      pl.BlockSpec(memory_space=pltpu.MemorySpace.VMEM),
                      pl.BlockSpec(memory_space=pltpu.MemorySpace.VMEM)],
            out_specs=pl.BlockSpec(memory_space=pltpu.MemorySpace.VMEM),
            compiler_params=pltpu.CompilerParams(
                vmem_limit_bytes=_VMEM_LIMIT),
            cost_estimate=pl.CostEstimate(
                flops=7 * n * c * hw, transcendentals=c,
                bytes_accessed=2 * n * c * hw * itemsize),
        )(g32, b32, x3)
        return out3.reshape(n, c, h, w)

    # ---------------------- streaming two-pass path ------------------------ #
    if hw_tile is None:
        hw_tile = _choose_hw_tile(hw, c, itemsize)
    num_t = pl.cdiv(hw, hw_tile)
    need_mask = (hw % hw_tile) != 0

    # Second parallel axis (spatial groups) so both v7x TensorCores engage
    # even when N == 1.  Only split when it divides the tile count cleanly.
    groups = 2 if (n == 1 and num_t >= 2 and num_t % 2 == 0) else 1
    tiles_per_group = num_t // groups
    num_partials = n * groups

    # ---- phase 1: per-(batch, group, channel) partial sums / ssq ---------- #
    sums, ssqs = pl.pallas_call(
        functools.partial(_bn_stats_kernel, hw_total=hw, hw_tile=hw_tile,
                          tiles_per_group=tiles_per_group, num_t=num_t,
                          need_mask=need_mask),
        out_shape=(jax.ShapeDtypeStruct((num_partials, c, 1), jnp.float32),
                   jax.ShapeDtypeStruct((num_partials, c, 1), jnp.float32)),
        grid_spec=pltpu.PrefetchScalarGridSpec(
            num_scalar_prefetch=0,
            grid=(n, groups, tiles_per_group),
            in_specs=[pl.BlockSpec(
                (1, c, hw_tile),
                lambda i, gi, t: (i, 0, gi * tiles_per_group + t))],
            out_specs=[
                pl.BlockSpec((1, c, 1), lambda i, gi, t: (i * groups + gi, 0, 0)),
                pl.BlockSpec((1, c, 1), lambda i, gi, t: (i * groups + gi, 0, 0)),
            ],
        ),
        compiler_params=pltpu.CompilerParams(
            dimension_semantics=("parallel", "parallel", "arbitrary"),
            vmem_limit_bytes=_VMEM_LIMIT),
        cost_estimate=pl.CostEstimate(
            flops=3 * n * c * hw, transcendentals=0,
            bytes_accessed=n * c * hw * itemsize + 2 * num_partials * c * 4),
    )(x3)

    # ---- phase 2: fully parallel streaming normalize (epilogue folded in) - #
    out3 = pl.pallas_call(
        functools.partial(_bn_apply_kernel, inv_m=1.0 / m, eps=float(eps)),
        out_shape=jax.ShapeDtypeStruct((n, c, hw), x_nchw.dtype),
        grid_spec=pltpu.PrefetchScalarGridSpec(
            num_scalar_prefetch=0,
            grid=(n, num_t),
            in_specs=[
                pl.BlockSpec((num_partials, c, 1), lambda i, t: (0, 0, 0)),
                pl.BlockSpec((num_partials, c, 1), lambda i, t: (0, 0, 0)),
                pl.BlockSpec((c, 1), lambda i, t: (0, 0)),
                pl.BlockSpec((c, 1), lambda i, t: (0, 0)),
                pl.BlockSpec((1, c, hw_tile), lambda i, t: (i, 0, t)),
            ],
            out_specs=pl.BlockSpec((1, c, hw_tile), lambda i, t: (i, 0, t)),
        ),
        compiler_params=pltpu.CompilerParams(
            dimension_semantics=("parallel", "parallel"),
            vmem_limit_bytes=_VMEM_LIMIT),
        cost_estimate=pl.CostEstimate(
            flops=2 * n * c * hw, transcendentals=c,
            bytes_accessed=2 * n * c * hw * itemsize),
    )(sums, ssqs, g32, b32, x3)

    return out3.reshape(n, c, h, w)          # free view back to NCHW


# --------------------- Module emulation (plain JAX glue) ------------------- #
class FLAGS:
    width_mult_list = [0.5, 1.0]


class SwitchableBatchNorm2dPallas:
    def __init__(self, num_features_list, key):
        self.num_features_list = num_features_list
        self.num_features = max(num_features_list)
        self.width_mult = max(FLAGS.width_mult_list)
        # One (gamma, beta) pair per width; deterministic non-trivial values.
        self.params = []
        for i, nf in enumerate(num_features_list):
            kg, kb = jax.random.split(jax.random.fold_in(key, i))
            gamma = 1.0 + 0.1 * jax.random.normal(kg, (nf,), jnp.float32)
            beta = 0.1 * jax.random.normal(kb, (nf,), jnp.float32)
            self.params.append((gamma, beta))
        # TODO(synk): running_mean/running_var buffer updates are stateful
        # training bookkeeping and do not affect the forward output; not modeled.

    def __call__(self, x_nchw):
        idx = FLAGS.width_mult_list.index(self.width_mult)
        gamma, beta = self.params[idx]
        assert x_nchw.shape[1] == self.num_features_list[idx]
        return batchnorm2d_pallas(x_nchw, gamma, beta)


# --------------------------------- main ------------------------------------ #
if __name__ == "__main__":
    key = jax.random.PRNGKey(0)
    kx, kp = jax.random.split(key)

    num_features_list = [2, 4]   # active branch = max width -> 4 channels
    module = SwitchableBatchNorm2dPallas(num_features_list, kp)
    gamma, beta = module.params[FLAGS.width_mult_list.index(module.width_mult)]

    def ref_bn(x):
        c = x.shape[1]
        mean = jnp.mean(x, axis=(0, 2, 3), keepdims=True)
        var = jnp.var(x, axis=(0, 2, 3), keepdims=True)
        y = (x - mean) / jnp.sqrt(var + EPS)
        return y * gamma.reshape(1, c, 1, 1) + beta.reshape(1, c, 1, 1)

    # 1) Fused single-pass path (default: activation fits in VMEM).
    x = jax.random.normal(kx, (2, 4, 16, 16), jnp.float32)
    y = jax.block_until_ready(module(x))
    assert jnp.max(jnp.abs(y - ref_bn(x))) < 1e-4

    # 2) Streaming two-pass path (forced), single spatial tile.
    y2 = jax.block_until_ready(
        batchnorm2d_pallas(x, gamma, beta, fused_vmem_bytes=0))
    assert jnp.max(jnp.abs(y2 - ref_bn(x))) < 1e-4

    # 3) Streaming path with multiple tiles and a masked partial last tile.
    x3 = jax.random.normal(jax.random.fold_in(kx, 1), (2, 4, 18, 18),
                           jnp.float32)
    y3 = jax.block_until_ready(
        batchnorm2d_pallas(x3, gamma, beta, fused_vmem_bytes=0, hw_tile=128))
    assert jnp.max(jnp.abs(y3 - ref_bn(x3))) < 1e-4

    # 4) Streaming path, N == 1 -> spatial-group second parallel axis.
    x4 = jax.random.normal(jax.random.fold_in(kx, 2), (1, 4, 16, 16),
                           jnp.float32)
    y4 = jax.block_until_ready(
        batchnorm2d_pallas(x4, gamma, beta, fused_vmem_bytes=0, hw_tile=128))
    assert jnp.max(jnp.abs(y4 - ref_bn(x4))) < 1e-4

    print("KERNEL_OK")
</pallas_src>

<mosaic_0001>
module attributes {stable_mosaic.version = 11 : i64} {
  func.func @_bn_fused_kernel(%arg0: memref<4x1xf32, #tpu.memory_space<vmem>>, %arg1: memref<4x1xf32, #tpu.memory_space<vmem>>, %arg2: memref<2x4x256xf32, #tpu.memory_space<vmem>>, %arg3: memref<2x4x256xf32, #tpu.memory_space<vmem>>) attributes {dimension_semantics = [], scalar_prefetch = 0 : i64, scratch_operands = 0 : i64, tpu.core_type = #tpu.core_type<tc>} {
    %c0 = arith.constant 0 : index
    %c0_0 = arith.constant 0 : index
    %c0_1 = arith.constant 0 : index
    %0 = vector.load %arg2[%c0, %c0_0, %c0_1] : memref<2x4x256xf32, #tpu.memory_space<vmem>>, vector<2x4x256xf32>
    %cst = arith.constant dense<0.000000e+00> : vector<2x4xf32>
    %1 = vector.multi_reduction <add>, %0, %cst [2] : vector<2x4x256xf32> to vector<2x4xf32>
    %2 = vector.shape_cast %1 : vector<2x4xf32> to vector<2x4x1xf32>
    %cst_2 = arith.constant dense<0.000000e+00> : vector<4x1xf32>
    %3 = vector.multi_reduction <add>, %2, %cst_2 [0] : vector<2x4x1xf32> to vector<4x1xf32>
    %4 = vector.shape_cast %3 : vector<4x1xf32> to vector<1x4x1xf32>
    %cst_3 = arith.constant 0.001953125 : f32
    %5 = vector.broadcast %cst_3 : f32 to vector<1x4x1xf32>
    %6 = arith.mulf %4, %5 : vector<1x4x1xf32>
    %7 = vector.broadcast %6 : vector<1x4x1xf32> to vector<2x4x256xf32>
    %8 = arith.subf %0, %7 : vector<2x4x256xf32>
    %9 = arith.mulf %8, %8 : vector<2x4x256xf32>
    %cst_4 = arith.constant dense<0.000000e+00> : vector<2x4xf32>
    %10 = vector.multi_reduction <add>, %9, %cst_4 [2] : vector<2x4x256xf32> to vector<2x4xf32>
    %11 = vector.shape_cast %10 : vector<2x4xf32> to vector<2x4x1xf32>
    %cst_5 = arith.constant dense<0.000000e+00> : vector<4x1xf32>
    %12 = vector.multi_reduction <add>, %11, %cst_5 [0] : vector<2x4x1xf32> to vector<4x1xf32>
    %13 = vector.shape_cast %12 : vector<4x1xf32> to vector<1x4x1xf32>
    %cst_6 = arith.constant 0.001953125 : f32
    %14 = vector.broadcast %cst_6 : f32 to vector<1x4x1xf32>
    %15 = arith.mulf %13, %14 : vector<1x4x1xf32>
    %cst_7 = arith.constant 9.99999974E-6 : f32
    %16 = vector.broadcast %cst_7 : f32 to vector<1x4x1xf32>
    %17 = arith.addf %15, %16 : vector<1x4x1xf32>
    %18 = math.rsqrt %17 : vector<1x4x1xf32>
    %c0_8 = arith.constant 0 : index
    %c0_9 = arith.constant 0 : index
    %19 = vector.load %arg0[%c0_8, %c0_9] : memref<4x1xf32, #tpu.memory_space<vmem>>, vector<4x1xf32>
    %20 = vector.shape_cast %19 : vector<4x1xf32> to vector<1x4x1xf32>
    %21 = arith.mulf %20, %18 : vector<1x4x1xf32>
    %c0_10 = arith.constant 0 : index
    %c0_11 = arith.constant 0 : index
    %22 = vector.load %arg1[%c0_10, %c0_11] : memref<4x1xf32, #tpu.memory_space<vmem>>, vector<4x1xf32>
    %23 = vector.shape_cast %22 : vector<4x1xf32> to vector<1x4x1xf32>
    %24 = vector.broadcast %21 : vector<1x4x1xf32> to vector<2x4x256xf32>
    %25 = arith.mulf %8, %24 : vector<2x4x256xf32>
    %26 = vector.broadcast %23 : vector<1x4x1xf32> to vector<2x4x256xf32>
    %27 = arith.addf %25, %26 : vector<2x4x256xf32>
    %c0_12 = arith.constant 0 : index
    %c0_13 = arith.constant 0 : index
    %c0_14 = arith.constant 0 : index
    %28 = vector.load %arg3[%c0_12, %c0_13, %c0_14] : memref<2x4x256xf32, #tpu.memory_space<vmem>>, vector<2x4x256xf32>
    tpu.vector_store %arg3[%c0_12, %c0_13, %c0_14], %27 {strides = array<i32>} : memref<2x4x256xf32, #tpu.memory_space<vmem>>, vector<2x4x256xf32>,
    return
  }
}

</mosaic_0001>

<bundles_post_ra>
// kernel: batchnorm2d_pallas.1
= control target key start
LH: loop header
LB: loop body
LE: loop exit
PB: predicated region body
PF: predicated region fallthrough
CT: control target
= control target key end

     0   :  { %vm22_vm0 = vcmask 1043456   ;;  %v117_v10 = vmov 839922192   ;;  %v41_v12 = vlaneseq  ;;  %v118_v35 = vmov 0   ;;  %s169_s2 = inlined_call_operand.vmem [shape: f32[2,4,256], index: 2, kind: input, shape index: {}]   ;;  %s170_s1 = inlined_call_operand.vmem [shape: f32[4,1], index: 1, kind: input, shape index: {}]   ;;  %s171_s0 = inlined_call_operand.vmem [shape: f32[4,1], index: 0, kind: input, shape index: {}]   ;;  %s172_s3 = inlined_call_operand.vmem [shape: f32[2,4,256], index: 3, kind: output, shape index: {}]  }
   0x1   :  { %v14_v0 = vld [vmem:[%s169_s2] sm:$0xff]  ;;  %v15_v1 = vld [vmem:[%s169_s2 + $0x8] sm:$0xff]  ;;  %v39_v11 = vunpack.c.l.s4 %v117_v10  ;;  %111 = vset.pattern.permute.xlu0 %v118_v35  ;;  %112 = vset.pattern.permute.xlu1 %v118_v35 }
   0x2   :  { %v18_v2 = vcombine.high %v14_v0, %v14_v0  ;;  %v23_v3 = vsel %vm22_vm0, %v14_v0, 0.0  ;;  %v19_v4 = vcombine.high %v15_v1, %v15_v1  ;;  %v28_v6 = vsel %vm22_vm0, %v15_v1, 0.0  ;;  %v74_v36 = vld [vmem:[%s170_s1] sm:$0xf] }
   0x3   :  { %v40_v14 = vunpack.c.0.s8 %v39_v11  ;;  %v42_v15 = vshrl.u32 %v41_v12, 7  ;;  %v72_v44 = vld [vmem:[%s171_s0] sm:$0xf] }
   0x4   :  { %v24_v5 = vsel %vm22_vm0, %v18_v2, 0.0  ;;  %v29_v7 = vsel %vm22_vm0, %v19_v4, 0.0 }
   0x5   :  { %v25_v8 = vadd.f32 %v24_v5, %v23_v3  ;;  %v30_v9 = vadd.f32 %v29_v7, %v28_v6  ;;  %v43_v19 = vsub.s32 %v40_v14, %v42_v15 }
   0x7   :  { %26 = vadd.xlane.f32.xlu0 %v25_v8 }
   0xb   :  { %31 = vadd.xlane.f32.xlu0 %v30_v9 }
  0x90   :  { %v27_v13 = vpop.xlane.xlu0 %26 }
  0x91   :  { %v33_v17 = vsel %vm22_vm0, %v27_v13, 0.0 }
  0x94   :  { %v32_v16 = vpop.xlane.xlu0 %31 }
  0x95   :  { %v34_v18 = vsel %vm22_vm0, %v32_v16, 0.0 }
  0x96   :  { %v35_v20 = vadd.f32 %v34_v18, %v33_v17 }
  0x98   :  { %v36_v21 = vmul.f32 0.001953125, %v35_v20 }
  0x9a   :  { %v44_v22 = vrot.slane %v36_v21, %v43_v19 }
  0x9c   :  { %v47_v23 = vsub.f32 %v15_v1, %v44_v22  ;;  %v46_v24 = vsub.f32 %v14_v0, %v44_v22 }
  0x9e   :  { %v48_v25 = vmul.f32 %v46_v24, %v46_v24  ;;  %v49_v26 = vmul.f32 %v47_v23, %v47_v23 }
  0xa0   :  { %v52_v27 = vcombine.high %v48_v25, %v48_v25  ;;  %v53_v28 = vcombine.high %v49_v26, %v49_v26  ;;  %v56_v29 = vsel %vm22_vm0, %v48_v25, 0.0  ;;  %v61_v33 = vsel %vm22_vm0, %v49_v26, 0.0 }
  0xa2   :  { %v57_v30 = vsel %vm22_vm0, %v52_v27, 0.0  ;;  %v62_v32 = vsel %vm22_vm0, %v53_v28, 0.0 }
  0xa3   :  { %v58_v31 = vadd.f32 %v57_v30, %v56_v29  ;;  %v63_v34 = vadd.f32 %v62_v32, %v61_v33 }
  0xa5   :  { %59 = vadd.xlane.f32.xlu1 %v58_v31 }
  0xa9   :  { %64 = vadd.xlane.f32.xlu1 %v63_v34 }
  0xba   :  { %91 = vperm.xlu1 %112, %v74_v36  }
 0x12e   :  { %v60_v37 = vpop.xlane.xlu1 %59 }
 0x12f   :  { %v66_v39 = vsel %vm22_vm0, %v60_v37, 0.0 }
 0x132   :  { %v65_v38 = vpop.xlane.xlu1 %64 }
 0x133   :  { %v67_v40 = vsel %vm22_vm0, %v65_v38, 0.0 }
 0x134   :  { %v68_v41 = vadd.f32 %v67_v40, %v66_v39 }
 0x136   :  { %v69_v42 = vmul.f32 0.001953125, %v68_v41  ;;  %v92_v47 = vpop.permute.xlu1 %91 }
 0x137   :  { %v99_v50 = vrot.slane %v92_v47, %v43_v19 }
 0x138   :  { %v70_v43 = vadd.f32 1e-05, %v69_v42 }
 0x13a   :  { %115 = vrsqrt.f32 %v70_v43 }
 0x147   :  { %v116_v45 = vpop.eup %115 }
 0x148   :  { %v73_v46 = vmul.f32 %v116_v45, %v72_v44 }
 0x14a   :  { %77 = vperm.xlu0 %111, %v73_v46  }
 0x1c5   :  { %v78_v48 = vpop.permute.xlu0 %77 }
 0x1c6   :  { %v85_v49 = vrot.slane %v78_v48, %v43_v19 }
 0x1c8   :  { %v87_v51 = vmul.f32 %v85_v49, %v46_v24  ;;  %v88_v52 = vmul.f32 %v85_v49, %v47_v23 }
 0x1ca   :  { %v101_v53 = vadd.f32 %v99_v50, %v87_v51  ;;  %v102_v54 = vadd.f32 %v99_v50, %v88_v52 }
 0x1cc   :  { %103 = vst [vmem:[%s172_s3] sm:$0xff] %v101_v53  ;;  %104 = vst [vmem:[%s172_s3 + $0x8] sm:$0xff] %v102_v54 }

</bundles_post_ra>
